<compile_context>
chip_gen: v5e
topology: v5e:2x2
jax: 0.10.0
libtpu: 0.0.40
codegen_flags: <defaults>
</compile_context>

<pallas_src>
from functools import partial

import jax
import jax.numpy as jnp
from jax import lax
from jax.experimental import pallas as pl
from jax.experimental.pallas import tpu as pltpu


_MASK_VALUE = -float(jnp.finfo(jnp.float32).max)


def _pick_tile(dim, preferred):
    """Largest tile <= preferred that is a multiple of 8 and divides `dim`.

    Falls back to the full dimension (always a legal BlockSpec) when no such
    divisor exists.
    """
    if dim <= preferred:
        return dim
    t = (preferred // 8) * 8
    while t >= 8:
        if dim % t == 0:
            return t
        t -= 8
    return dim


# ---------------------------------------------------------------------------
# Fast path: tiled online-softmax kernel (no attention-map outputs).
# ---------------------------------------------------------------------------
def _flash_attend_kernel(q_ref, k_ref, v_ref, out_ref,
                         q_scr, m_scr, l_scr, acc_scr,
                         *, scale, causal, skip_dead, n_len, j_len,
                         gsz, block_q, block_k):
    qi = pl.program_id(2)
    ki = pl.program_id(3)
    rows = gsz * block_q
    head_dim = q_ref.shape[-1]

    @pl.when(ki == 0)
    def _init():
        # Fold the softmax scale into q once per q tile; reused for every kv
        # step (saves (J/tk - 1) * rows * D VPU mults per q tile).
        q = q_ref[0].reshape(rows, head_dim)
        q_scr[...] = (q * scale).astype(q_scr.dtype)
        m_scr[...] = jnp.full(m_scr.shape, _MASK_VALUE, jnp.float32)
        l_scr[...] = jnp.zeros(l_scr.shape, jnp.float32)
        acc_scr[...] = jnp.zeros(acc_scr.shape, jnp.float32)

    def _step(apply_mask):
        q = q_scr[...]                               # (rows, D), already scaled
        k = k_ref[0, 0]                              # (tk, D)
        v = v_ref[0, 0]                              # (tk, D)

        # scores = (q * scale) @ k^T: contraction over D of both operands,
        # no materialized transpose (feeds the MXU directly).
        s = lax.dot_general(q, k, (((1,), (1,)), ((), ())),
                            preferred_element_type=jnp.float32)   # (rows, tk)

        if apply_mask:
            row = lax.broadcasted_iota(jnp.int32, (gsz, block_q, block_k), 1)
            row = row.reshape(rows, block_k)
            col = lax.broadcasted_iota(jnp.int32, (rows, block_k), 1)
            bad = (ki * block_k + col) > (qi * block_q + row + (j_len - n_len))
            s = jnp.where(bad, _MASK_VALUE, s)

        m_prev = m_scr[...]
        m_new = jnp.maximum(m_prev, jnp.max(s, axis=-1, keepdims=True))
        alpha = jnp.exp(m_prev - m_new)
        p = jnp.exp(s - m_new)

        l_scr[...] = alpha * l_scr[...] + jnp.sum(p, axis=-1, keepdims=True)
        # Cast attn weights to v's dtype (matches `attn.type(dtype)` in the
        # reference and keeps the PV matmul on the fast MXU path for bf16).
        acc_scr[...] = alpha * acc_scr[...] + lax.dot_general(
            p.astype(v.dtype), v, (((1,), (0,)), ((), ())),
            preferred_element_type=jnp.float32)
        m_scr[...] = m_new

    if causal:
        offset = j_len - n_len
        first_row = qi * block_q
        last_row = first_row + (block_q - 1)
        first_col = ki * block_k
        last_col = first_col + (block_k - 1)
        needs_mask = last_col > first_row + offset      # tile touches boundary
        if skip_dead:
            # j_len >= n_len: fully-dead tiles can be skipped entirely (their
            # K/V DMA is also elided by the clamped index_map in the wrapper).
            live = first_col <= last_row + offset

            @pl.when(live & needs_mask)
            def _():
                _step(True)

            @pl.when(live & jnp.logical_not(needs_mask))
            def _():
                _step(False)
        else:
            # j_len < n_len: every tile participates, so fully-masked rows fall
            # back to uniform attention exactly like the reference finite mask.
            @pl.when(needs_mask)
            def _():
                _step(True)

            @pl.when(jnp.logical_not(needs_mask))
            def _():
                _step(False)
    else:
        _step(False)

    @pl.when(ki == pl.num_programs(3) - 1)
    def _finalize():
        inv = 1.0 / l_scr[...]          # exact: only gsz*block_q values
        out = (acc_scr[...] * inv).reshape(gsz, block_q, head_dim)
        out_ref[0] = out.astype(out_ref.dtype)


# ---------------------------------------------------------------------------
# Debug path: writes the (B,H,N,J) intermediates like the PyTorch module.
# ---------------------------------------------------------------------------
def _attend_debug_kernel(q_ref, k_ref, v_ref, *refs,
                         scale, causal, n_len, j_len, block_q):
    if causal:
        out_ref, qk_ref, pre_ref, post_ref = refs
    else:
        out_ref, qk_ref, post_ref = refs
        pre_ref = None   # identical to qk when not causal; aliased in wrapper

    qi = pl.program_id(2)
    q = q_ref[0, 0] * scale
    k = k_ref[0, 0]
    v = v_ref[0, 0]

    dots = lax.dot_general(q, k, (((1,), (1,)), ((), ())),
                           preferred_element_type=jnp.float32)    # (tq, J)
    qk_ref[0, 0] = dots.astype(qk_ref.dtype)                      # qk_similarities

    if causal:
        row = lax.broadcasted_iota(jnp.int32, dots.shape, 0)
        col = lax.broadcasted_iota(jnp.int32, dots.shape, 1)
        dots = jnp.where(col > qi * block_q + row + (j_len - n_len),
                         _MASK_VALUE, dots)
        pre_ref[0, 0] = dots.astype(pre_ref.dtype)                # pre_softmax_attn

    # softmax in float32 (attn_fn = partial(F.softmax, dtype=torch.float32))
    m = jnp.max(dots, axis=-1, keepdims=True)
    e = jnp.exp(dots - m)
    s = jnp.sum(e, axis=-1, keepdims=True)
    attn = (e * (1.0 / s)).astype(post_ref.dtype)                 # attn.type(dtype)
    post_ref[0, 0] = attn                                         # post_softmax_attn

    out = lax.dot_general(attn.astype(v.dtype), v, (((1,), (0,)), ((), ())),
                          preferred_element_type=jnp.float32)
    out_ref[0, 0] = out.astype(out_ref.dtype)


def _attend_debug(q, k, v, *, causal, scale, block_q):
    B, H, N, D = q.shape
    _, KVH, J, _ = k.shape
    out_dtype = q.dtype
    attn_dtype = q.dtype
    tq = _pick_tile(N, min(block_q, 256))
    grid = (B, H, N // tq)
    kernel = partial(_attend_debug_kernel, scale=scale, causal=causal,
                     n_len=N, j_len=J, block_q=tq)

    out_shapes = [jax.ShapeDtypeStruct((B, H, N, D), out_dtype),
                  jax.ShapeDtypeStruct((B, H, N, J), attn_dtype)]
    out_specs = [pl.BlockSpec((1, 1, tq, D), lambda b, h, qi: (b, h, qi, 0)),
                 pl.BlockSpec((1, 1, tq, J), lambda b, h, qi: (b, h, qi, 0))]
    if causal:   # pre_softmax_attn only differs from qk when the mask applies
        out_shapes.append(jax.ShapeDtypeStruct((B, H, N, J), attn_dtype))
        out_specs.append(pl.BlockSpec((1, 1, tq, J),
                                      lambda b, h, qi: (b, h, qi, 0)))
    out_shapes.append(jax.ShapeDtypeStruct((B, H, N, J), attn_dtype))
    out_specs.append(pl.BlockSpec((1, 1, tq, J),
                                  lambda b, h, qi: (b, h, qi, 0)))

    # TODO(synk): for very long J this debug path holds full-J K/V blocks and
    # (tq, J) outputs in VMEM; tile J with an extra grid axis for v7x budgets.
    results = pl.pallas_call(
        kernel,
        out_shape=tuple(out_shapes),
        grid_spec=pltpu.PrefetchScalarGridSpec(
            num_scalar_prefetch=0,
            grid=grid,
            in_specs=[
                pl.BlockSpec((1, 1, tq, D), lambda b, h, qi: (b, h, qi, 0)),
                # GQA per the module: query head h uses kv head h % KVH.
                pl.BlockSpec((1, 1, J, D), lambda b, h, qi: (b, h % KVH, 0, 0)),
                pl.BlockSpec((1, 1, J, D), lambda b, h, qi: (b, h % KVH, 0, 0)),
            ],
            out_specs=out_specs),
        compiler_params=pltpu.CompilerParams(
            dimension_semantics=("parallel", "parallel", "parallel")),
    )(q, k, v)

    if causal:
        out, qk_sim, pre_sm, post_sm = results
    else:
        out, qk_sim, post_sm = results
        pre_sm = qk_sim                      # bit-identical when not causal
    return out, (qk_sim, pre_sm, post_sm)


# ---------------------------------------------------------------------------
# Wrapper
# ---------------------------------------------------------------------------
def attend_forward(q, k, v, *, causal=False, scale=None,
                   return_intermediates=False,
                   block_q=512, block_k=512):
    """Pallas equivalent of Attend.forward (default config).

    q: (B, H, N, D);  k, v: (B, KVH, J, D) with KVH dividing H (GQA/MQA,
    query head h -> kv head h % KVH, matching the module's einops repeat).
    Returns (out, (qk_similarities, pre_softmax_attn, post_softmax_attn)).
    The intermediates are only materialized when return_intermediates=True.
    """
    B, H, N, D = q.shape
    kb, KVH, J, kd = k.shape
    assert kb == B and kd == D and v.shape == k.shape
    assert H % KVH == 0, "kv heads must divide query heads"
    rep = H // KVH
    scale = float(D ** -0.5 if scale is None else scale)
    out_dtype = q.dtype

    if return_intermediates:
        return _attend_debug(q, k, v, causal=causal, scale=scale,
                             block_q=block_q)

    # ---- fast path: tiled online-softmax ("flash") kernel -----------------
    sub = max(8, 32 // q.dtype.itemsize)        # sublane multiple for dtype
    tq = _pick_tile(N, min(block_q, max(64, 1024 // max(rep, 1))))
    tk = _pick_tile(J, block_k)
    grouped = rep > 1 and tq % sub == 0         # safe to merge heads into rows
    if grouped:
        n_groups, gsz = KVH, rep
    else:
        n_groups, gsz = H, 1
    rows = gsz * tq
    num_kb = J // tk
    grid = (B, n_groups, N // tq, num_kb)
    skip_dead = causal and (J >= N)

    # GQA: regroup query heads so each kv head's group is contiguous; one
    # fetched K/V tile then serves all `rep` heads of its group (K/V HBM
    # traffic / rep).  No regrouping needed for KVH==1 or KVH==H.
    regroup = grouped and (1 < KVH < H)
    if regroup:
        q_in = q.reshape(B, rep, KVH, N, D).transpose(0, 2, 1, 3, 4)
        q_in = q_in.reshape(B, H, N, D)
    else:
        q_in = q

    if grouped:
        def _kv_head(g):
            return g
    else:
        def _kv_head(h):
            return h % KVH

    def q_index(b, g, qi, ki):
        return (b, g, qi, 0)

    if skip_dead:
        def kv_index(b, g, qi, ki):
            # Clamp dead (fully masked) kv tiles to the last live one so the
            # pipeline elides their HBM fetch entirely.
            last_live = jnp.minimum(
                (qi * tq + (tq - 1) + (J - N)) // tk, num_kb - 1)
            return (b, _kv_head(g), jnp.minimum(ki, last_live), 0)
    else:
        def kv_index(b, g, qi, ki):
            return (b, _kv_head(g), ki, 0)

    kernel = partial(_flash_attend_kernel, scale=scale, causal=causal,
                     skip_dead=skip_dead, n_len=N, j_len=J,
                     gsz=gsz, block_q=tq, block_k=tk)

    itemsize = q.dtype.itemsize
    vmem_est = (3 * rows * D * itemsize           # q block (x2) + scaled-q scratch
                + 2 * rows * D * itemsize         # out block (x2)
                + 4 * tk * D * k.dtype.itemsize   # k + v blocks (x2 each)
                + rows * D * 4 + 2 * rows * 4     # acc + m + l (f32)
                + 3 * rows * tk * 4)              # score/prob temporaries
    vmem_limit = int(min(max(2 * vmem_est, 32 * 1024 * 1024),
                         64 * 1024 * 1024))       # v7x-safe cap

    causal_frac = (1.0 - 0.5 * N / J) if skip_dead else 1.0
    kv_amp = (N // tq) * (1 if grouped else rep)
    cost = pl.CostEstimate(
        flops=int(4 * B * H * N * J * D * causal_frac),
        transcendentals=int(B * H * N * J * causal_frac),
        bytes_accessed=int(2 * q.nbytes
                           + (k.nbytes + v.nbytes) * kv_amp * causal_frac))

    out = pl.pallas_call(
        kernel,
        out_shape=jax.ShapeDtypeStruct((B, H, N, D), out_dtype),
        grid_spec=pltpu.PrefetchScalarGridSpec(
            num_scalar_prefetch=0,
            grid=grid,
            in_specs=[
                pl.BlockSpec((1, gsz, tq, D), q_index),
                pl.BlockSpec((1, 1, tk, D), kv_index),
                pl.BlockSpec((1, 1, tk, D), kv_index),
            ],
            out_specs=pl.BlockSpec((1, gsz, tq, D), q_index),
            scratch_shapes=[
                pltpu.VMEM((rows, D), q.dtype),       # scaled q
                pltpu.VMEM((rows, 1), jnp.float32),   # running max
                pltpu.VMEM((rows, 1), jnp.float32),   # running denominator
                pltpu.VMEM((rows, D), jnp.float32),   # output accumulator
            ]),
        compiler_params=pltpu.CompilerParams(
            dimension_semantics=("parallel", "parallel", "parallel",
                                 "arbitrary"),
            vmem_limit_bytes=vmem_limit),
        cost_estimate=cost,
    )(q_in, k, v)

    if regroup:
        out = out.reshape(B, KVH, rep, N, D).transpose(0, 2, 1, 3, 4)
        out = out.reshape(B, H, N, D)
    return out, (None, None, None)


# ---------------------------------------------------------------------------
# Plain-JAX reference (transcription of Attend.forward) for verification.
# ---------------------------------------------------------------------------
def _reference_forward(q, k, v, *, causal=False, scale=None):
    B, H, N, D = q.shape
    KVH = k.shape[1]
    if KVH != H:
        # matches einops repeat 'b kvh n d -> b (r kvh) n d'
        k = jnp.tile(k, (1, H // KVH, 1, 1))
        v = jnp.tile(v, (1, H // KVH, 1, 1))
    scale = D ** -0.5 if scale is None else scale
    dots = jnp.einsum('bhid,bhjd->bhij', q, k) * scale
    qk_sim = dots
    if causal:
        i, j = dots.shape[-2:]
        row = jnp.arange(i)[:, None]
        col = jnp.arange(j)[None, :]
        dots = jnp.where(col > row + (j - i), _MASK_VALUE, dots)
    pre = dots
    attn = jax.nn.softmax(dots.astype(jnp.float32), axis=-1).astype(q.dtype)
    post = attn
    out = jnp.einsum('bhij,bhjd->bhid', attn, v)
    return out, (qk_sim, pre, post)


if __name__ == "__main__":
    # Case 1: tiny shapes, GQA (kv head = h % KVH), causal, debug path that
    # also materializes the attention-map intermediates.
    B, H, KVH, N, J, D = 2, 4, 2, 8, 8, 32
    kq, kk, kvv = jax.random.split(jax.random.PRNGKey(0), 3)
    q = jax.random.normal(kq, (B, H, N, D), dtype=jnp.float32)
    k = jax.random.normal(kk, (B, KVH, J, D), dtype=jnp.float32)
    v = jax.random.normal(kvv, (B, KVH, J, D), dtype=jnp.float32)

    out, (qk_sim, pre_sm, post_sm) = attend_forward(
        q, k, v, causal=True, return_intermediates=True)
    jax.block_until_ready(out)
    r_out, (r_qk, r_pre, r_post) = _reference_forward(q, k, v, causal=True)
    assert jnp.allclose(out, r_out, atol=2e-3, rtol=2e-3)
    assert jnp.allclose(qk_sim, r_qk, atol=1e-4, rtol=1e-4)
    assert jnp.allclose(pre_sm, r_pre, atol=1e-4, rtol=1e-4)
    assert jnp.allclose(post_sm, r_post, atol=2e-3, rtol=2e-3)

    # Case 2: fast path, multiple q/kv tiles, GQA group blocking (query heads
    # regrouped per kv head), causal tile skipping + clamped kv index map.
    B, H, KVH, N, J, D = 1, 4, 2, 256, 256, 64
    kq, kk, kvv = jax.random.split(jax.random.PRNGKey(1), 3)
    q = jax.random.normal(kq, (B, H, N, D), dtype=jnp.float32)
    k = jax.random.normal(kk, (B, KVH, J, D), dtype=jnp.float32)
    v = jax.random.normal(kvv, (B, KVH, J, D), dtype=jnp.float32)
    for causal in (False, True):
        out, _ = attend_forward(q, k, v, causal=causal,
                                block_q=64, block_k=64)
        jax.block_until_ready(out)
        r_out, _ = _reference_forward(q, k, v, causal=causal)
        assert jnp.allclose(out, r_out, atol=2e-3, rtol=2e-3), causal

    # Case 3: standard MHA (KVH == H), cross-attention lengths J > N, causal
    # with a non-zero causal offset.
    B, H, KVH, N, J, D = 1, 2, 2, 64, 192, 64
    kq, kk, kvv = jax.random.split(jax.random.PRNGKey(2), 3)
    q = jax.random.normal(kq, (B, H, N, D), dtype=jnp.float32)
    k = jax.random.normal(kk, (B, KVH, J, D), dtype=jnp.float32)
    v = jax.random.normal(kvv, (B, KVH, J, D), dtype=jnp.float32)
    out, _ = attend_forward(q, k, v, causal=True, block_q=64, block_k=64)
    jax.block_until_ready(out)
    r_out, _ = _reference_forward(q, k, v, causal=True)
    assert jnp.allclose(out, r_out, atol=2e-3, rtol=2e-3)

    # Case 4: MQA (KVH == 1) with J < N and causal: fully-masked rows must
    # fall back to uniform attention exactly like the reference finite mask.
    B, H, KVH, N, J, D = 1, 2, 1, 64, 32, 64
    kq, kk, kvv = jax.random.split(jax.random.PRNGKey(3), 3)
    q = jax.random.normal(kq, (B, H, N, D), dtype=jnp.float32)
    k = jax.random.normal(kk, (B, KVH, J, D), dtype=jnp.float32)
    v = jax.random.normal(kvv, (B, KVH, J, D), dtype=jnp.float32)
    out, _ = attend_forward(q, k, v, causal=True, block_q=32, block_k=32)
    jax.block_until_ready(out)
    r_out, _ = _reference_forward(q, k, v, causal=True)
    assert jnp.allclose(out, r_out, atol=2e-3, rtol=2e-3)

    print("KERNEL_OK")
</pallas_src>

<mosaic_0001>
module attributes {stable_mosaic.version = 11 : i64} {
  func.func @_attend_debug_kernel(%arg0: i32, %arg1: i32, %arg2: i32, %arg3: memref<1x1x8x32xf32, #tpu.memory_space<vmem>>, %arg4: memref<1x1x8x32xf32, #tpu.memory_space<vmem>>, %arg5: memref<1x1x8x32xf32, #tpu.memory_space<vmem>>, %arg6: memref<1x1x8x32xf32, #tpu.memory_space<vmem>>, %arg7: memref<1x1x8x8xf32, #tpu.memory_space<vmem>>, %arg8: memref<1x1x8x8xf32, #tpu.memory_space<vmem>>, %arg9: memref<1x1x8x8xf32, #tpu.memory_space<vmem>>) attributes {dimension_semantics = [#tpu.dimension_semantics<parallel>, #tpu.dimension_semantics<parallel>, #tpu.dimension_semantics<parallel>], iteration_bounds = array<i64: 2, 4, 1>, scalar_prefetch = 0 : i64, scratch_operands = 0 : i64, tpu.core_type = #tpu.core_type<tc>, window_params = [{transform_indices = @transform_0, window_bounds = array<i64: 1, 1, 8, 32>}, {transform_indices = @transform_1, window_bounds = array<i64: 1, 1, 8, 32>}, {transform_indices = @transform_2, window_bounds = array<i64: 1, 1, 8, 32>}, {transform_indices = @transform_3, window_bounds = array<i64: 1, 1, 8, 32>}, {transform_indices = @transform_4, window_bounds = array<i64: 1, 1, 8, 8>}, {transform_indices = @transform_5, window_bounds = array<i64: 1, 1, 8, 8>}, {transform_indices = @transform_6, window_bounds = array<i64: 1, 1, 8, 8>}]} {
    %c0 = arith.constant 0 : index
    %c0_0 = arith.constant 0 : index
    %c0_1 = arith.constant 0 : index
    %c0_2 = arith.constant 0 : index
    %0 = vector.load %arg3[%c0, %c0_0, %c0_1, %c0_2] : memref<1x1x8x32xf32, #tpu.memory_space<vmem>>, vector<1x1x8x32xf32>
    %1 = vector.shape_cast %0 : vector<1x1x8x32xf32> to vector<8x32xf32>
    %cst = arith.constant 0.176776692 : f32
    %2 = vector.broadcast %cst : f32 to vector<8x32xf32>
    %3 = arith.mulf %1, %2 : vector<8x32xf32>
    %c0_3 = arith.constant 0 : index
    %c0_4 = arith.constant 0 : index
    %c0_5 = arith.constant 0 : index
    %c0_6 = arith.constant 0 : index
    %4 = vector.load %arg4[%c0_3, %c0_4, %c0_5, %c0_6] : memref<1x1x8x32xf32, #tpu.memory_space<vmem>>, vector<1x1x8x32xf32>
    %5 = vector.shape_cast %4 : vector<1x1x8x32xf32> to vector<8x32xf32>
    %c0_7 = arith.constant 0 : index
    %c0_8 = arith.constant 0 : index
    %c0_9 = arith.constant 0 : index
    %c0_10 = arith.constant 0 : index
    %6 = vector.load %arg5[%c0_7, %c0_8, %c0_9, %c0_10] : memref<1x1x8x32xf32, #tpu.memory_space<vmem>>, vector<1x1x8x32xf32>
    %7 = vector.shape_cast %6 : vector<1x1x8x32xf32> to vector<8x32xf32>
    %cst_11 = arith.constant dense<0.000000e+00> : vector<8x8xf32>
    %8 = tpu.matmul %3, %5, %cst_11 {dimension_numbers = #tpu.dot_dimension_numbers<[1], [1], [0], [0], [0, 0, 1, 0], [], []>} : vector<8x32xf32>, vector<8x32xf32>, vector<8x8xf32> -> vector<8x8xf32>
    %c0_12 = arith.constant 0 : index
    %c0_13 = arith.constant 0 : index
    %c0_14 = arith.constant 0 : index
    %c0_15 = arith.constant 0 : index
    %9 = vector.load %arg7[%c0_12, %c0_13, %c0_14, %c0_15] : memref<1x1x8x8xf32, #tpu.memory_space<vmem>>, vector<1x1x8x8xf32>
    %10 = vector.shape_cast %9 : vector<1x1x8x8xf32> to vector<8x8xf32>
    %11 = vector.shape_cast %8 : vector<8x8xf32> to vector<1x1x8x8xf32>
    tpu.vector_store %arg7[%c0_12, %c0_13, %c0_14, %c0_15], %11 {strides = array<i32>} : memref<1x1x8x8xf32, #tpu.memory_space<vmem>>, vector<1x1x8x8xf32>,
    %12 = tpu.iota {dimensions = array<i32: 0>} : vector<8x8xi32>
    %13 = tpu.iota {dimensions = array<i32: 1>} : vector<8x8xi32>
    %c8_i32 = arith.constant 8 : i32
    %14 = arith.muli %arg2, %c8_i32 : i32
    %15 = vector.broadcast %14 : i32 to vector<8x8xi32>
    %16 = arith.addi %15, %12 : vector<8x8xi32>
    %c0_i32 = arith.constant 0 : i32
    %17 = vector.broadcast %c0_i32 : i32 to vector<8x8xi32>
    %18 = arith.addi %16, %17 : vector<8x8xi32>
    %19 = arith.cmpi sgt, %13, %18 : vector<8x8xi32>
    %cst_16 = arith.constant -3.40282347E+38 : f32
    %20 = vector.broadcast %cst_16 : f32 to vector<8x8xf32>
    %21 = arith.select %19, %20, %8 : vector<8x8xi1>, vector<8x8xf32>
    %c0_17 = arith.constant 0 : index
    %c0_18 = arith.constant 0 : index
    %c0_19 = arith.constant 0 : index
    %c0_20 = arith.constant 0 : index
    %22 = vector.load %arg8[%c0_17, %c0_18, %c0_19, %c0_20] : memref<1x1x8x8xf32, #tpu.memory_space<vmem>>, vector<1x1x8x8xf32>
    %23 = vector.shape_cast %22 : vector<1x1x8x8xf32> to vector<8x8xf32>
    %24 = vector.shape_cast %21 : vector<8x8xf32> to vector<1x1x8x8xf32>
    tpu.vector_store %arg8[%c0_17, %c0_18, %c0_19, %c0_20], %24 {strides = array<i32>} : memref<1x1x8x8xf32, #tpu.memory_space<vmem>>, vector<1x1x8x8xf32>,
    %cst_21 = arith.constant dense<0xFF800000> : vector<8xf32>
    %25 = vector.multi_reduction <maximumf>, %21, %cst_21 [1] : vector<8x8xf32> to vector<8xf32>
    %26 = vector.shape_cast %25 : vector<8xf32> to vector<8x1xf32>
    %27 = vector.broadcast %26 : vector<8x1xf32> to vector<8x8xf32>
    %28 = arith.subf %21, %27 : vector<8x8xf32>
    %29 = math.exp %28 : vector<8x8xf32>
    %cst_22 = arith.constant dense<0.000000e+00> : vector<8xf32>
    %30 = vector.multi_reduction <add>, %29, %cst_22 [1] : vector<8x8xf32> to vector<8xf32>
    %31 = vector.shape_cast %30 : vector<8xf32> to vector<8x1xf32>
    %cst_23 = arith.constant 1.000000e+00 : f32
    %32 = vector.broadcast %cst_23 : f32 to vector<8x1xf32>
    %33 = arith.divf %32, %31 : vector<8x1xf32>
    %34 = vector.broadcast %33 : vector<8x1xf32> to vector<8x8xf32>
    %35 = arith.mulf %29, %34 : vector<8x8xf32>
    %c0_24 = arith.constant 0 : index
    %c0_25 = arith.constant 0 : index
    %c0_26 = arith.constant 0 : index
    %c0_27 = arith.constant 0 : index
    %36 = vector.load %arg9[%c0_24, %c0_25, %c0_26, %c0_27] : memref<1x1x8x8xf32, #tpu.memory_space<vmem>>, vector<1x1x8x8xf32>
    %37 = vector.shape_cast %36 : vector<1x1x8x8xf32> to vector<8x8xf32>
    %38 = vector.shape_cast %35 : vector<8x8xf32> to vector<1x1x8x8xf32>
    tpu.vector_store %arg9[%c0_24, %c0_25, %c0_26, %c0_27], %38 {strides = array<i32>} : memref<1x1x8x8xf32, #tpu.memory_space<vmem>>, vector<1x1x8x8xf32>,
    %cst_28 = arith.constant dense<0.000000e+00> : vector<8x32xf32>
    %39 = tpu.matmul %35, %7, %cst_28 {dimension_numbers = #tpu.dot_dimension_numbers<[1], [0], [0], [1], [0, 0, 1, 1], [], []>} : vector<8x8xf32>, vector<8x32xf32>, vector<8x32xf32> -> vector<8x32xf32>
    %c0_29 = arith.constant 0 : index
    %c0_30 = arith.constant 0 : index
    %c0_31 = arith.constant 0 : index
    %c0_32 = arith.constant 0 : index
    %40 = vector.load %arg6[%c0_29, %c0_30, %c0_31, %c0_32] : memref<1x1x8x32xf32, #tpu.memory_space<vmem>>, vector<1x1x8x32xf32>
    %41 = vector.shape_cast %40 : vector<1x1x8x32xf32> to vector<8x32xf32>
    %42 = vector.shape_cast %39 : vector<8x32xf32> to vector<1x1x8x32xf32>
    tpu.vector_store %arg6[%c0_29, %c0_30, %c0_31, %c0_32], %42 {strides = array<i32>} : memref<1x1x8x32xf32, #tpu.memory_space<vmem>>, vector<1x1x8x32xf32>,
    return
  }
  func.func @transform_0(%arg0: i32, %arg1: i32, %arg2: i32) -> (i32, i32, i32, i32) {
    %c0_i32 = arith.constant 0 : i32
    %c0_i32_0 = arith.constant 0 : i32
    return %arg0, %arg1, %arg2, %c0_i32 : i32, i32, i32, i32
  }
  func.func @transform_1(%arg0: i32, %arg1: i32, %arg2: i32) -> (i32, i32, i32, i32) {
    %c2_i32 = arith.constant 2 : i32
    %c0_i32 = arith.constant 0 : i32
    %0 = arith.cmpi eq, %c2_i32, %c0_i32 : i32
    %c1_i32 = arith.constant 1 : i32
    %1 = arith.select %0, %c1_i32, %c2_i32 : i32
    %2 = arith.remsi %arg1, %1 : i32
    %c0_i32_0 = arith.constant 0 : i32
    %3 = arith.cmpi ne, %2, %c0_i32_0 : i32
    %c0_i32_1 = arith.constant 0 : i32
    %4 = arith.cmpi slt, %2, %c0_i32_1 : i32
    %c0_i32_2 = arith.constant 0 : i32
    %5 = arith.cmpi slt, %1, %c0_i32_2 : i32
    %6 = arith.xori %4, %5 : i1
    %7 = arith.andi %6, %3 : i1
    %8 = arith.addi %2, %1 : i32
    %9 = arith.select %7, %8, %2 : i32
    %c0_i32_3 = arith.constant 0 : i32
    %c0_i32_4 = arith.constant 0 : i32
    %c0_i32_5 = arith.constant 0 : i32
    return %arg0, %9, %c0_i32_3, %c0_i32_4 : i32, i32, i32, i32
  }
  func.func @transform_2(%arg0: i32, %arg1: i32, %arg2: i32) -> (i32, i32, i32, i32) {
    %c2_i32 = arith.constant 2 : i32
    %c0_i32 = arith.constant 0 : i32
    %0 = arith.cmpi eq, %c2_i32, %c0_i32 : i32
    %c1_i32 = arith.constant 1 : i32
    %1 = arith.select %0, %c1_i32, %c2_i32 : i32
    %2 = arith.remsi %arg1, %1 : i32
    %c0_i32_0 = arith.constant 0 : i32
    %3 = arith.cmpi ne, %2, %c0_i32_0 : i32
    %c0_i32_1 = arith.constant 0 : i32
    %4 = arith.cmpi slt, %2, %c0_i32_1 : i32
    %c0_i32_2 = arith.constant 0 : i32
    %5 = arith.cmpi slt, %1, %c0_i32_2 : i32
    %6 = arith.xori %4, %5 : i1
    %7 = arith.andi %6, %3 : i1
    %8 = arith.addi %2, %1 : i32
    %9 = arith.select %7, %8, %2 : i32
    %c0_i32_3 = arith.constant 0 : i32
    %c0_i32_4 = arith.constant 0 : i32
    %c0_i32_5 = arith.constant 0 : i32
    return %arg0, %9, %c0_i32_3, %c0_i32_4 : i32, i32, i32, i32
  }
  func.func @transform_3(%arg0: i32, %arg1: i32, %arg2: i32) -> (i32, i32, i32, i32) {
    %c0_i32 = arith.constant 0 : i32
    %c0_i32_0 = arith.constant 0 : i32
    return %arg0, %arg1, %arg2, %c0_i32 : i32, i32, i32, i32
  }
  func.func @transform_4(%arg0: i32, %arg1: i32, %arg2: i32) -> (i32, i32, i32, i32) {
    %c0_i32 = arith.constant 0 : i32
    %c0_i32_0 = arith.constant 0 : i32
    return %arg0, %arg1, %arg2, %c0_i32 : i32, i32, i32, i32
  }
  func.func @transform_5(%arg0: i32, %arg1: i32, %arg2: i32) -> (i32, i32, i32, i32) {
    %c0_i32 = arith.constant 0 : i32
    %c0_i32_0 = arith.constant 0 : i32
    return %arg0, %arg1, %arg2, %c0_i32 : i32, i32, i32, i32
  }
  func.func @transform_6(%arg0: i32, %arg1: i32, %arg2: i32) -> (i32, i32, i32, i32) {
    %c0_i32 = arith.constant 0 : i32
    %c0_i32_0 = arith.constant 0 : i32
    return %arg0, %arg1, %arg2, %c0_i32 : i32, i32, i32, i32
  }
}

</mosaic_0001>

<bundles_post_ra>
// kernel: tpu_custom_call.1
= control target key start
LH: loop header
LB: loop body
LE: loop exit
PB: predicated region body
PF: predicated region fallthrough
CT: control target
= control target key end

     0   :  { %s1825_s0 = inlined_call_operand.hbm [shape: f32[2,4,8,32], index: 0, kind: input, shape index: {}]   ;;  %s1826_s1 = inlined_call_operand.hbm [shape: f32[2,2,8,32], index: 1, kind: input, shape index: {}]   ;;  %s1827_s2 = inlined_call_operand.hbm [shape: f32[2,2,8,32], index: 2, kind: input, shape index: {}]   ;;  %s1828_s3 = inlined_call_operand.hbm [shape: f32[2,4,8,32], index: 3, kind: output, shape index: {0}]   ;;  %s1829_s4 = inlined_call_operand.hbm [shape: f32[2,4,8,8], index: 4, kind: output, shape index: {1}]   ;;  %s1830_s5 = inlined_call_operand.hbm [shape: f32[2,4,8,8], index: 5, kind: output, shape index: {2}]   ;;  %s1831_s6 = inlined_call_operand.hbm [shape: f32[2,4,8,8], index: 6, kind: output, shape index: {3}]  }
   0x1   :  { %1844 = sst [smem:[#allocation29_spill]] %s1826_s1 }
   0x2   :  { %1845 = sst [smem:[#allocation30_spill]] %s1828_s3 }
   0x3   :  { %1846 = sst [smem:[#allocation31_spill]] %s1829_s4 }
   0x4   :  { %1847 = sst [smem:[#allocation32_spill]] %s1830_s5 }
   0x5   :  { %1848 = sst [smem:[#allocation33_spill]] %s1831_s6 }
   0x6   :  { %12 = vsyncpa [#allocation3], 0 }
   0x7   :  { %14 = vsyncpa [#allocation3 + $0x1], 0 }
   0x8   :  { %15 = vsyncpa [#allocation6], 0 }
   0x9   :  { %17 = vsyncpa [#allocation6 + $0x1], 0 }
   0xa   :  { %18 = vsyncpa [#allocation4], 0 }
   0xb   :  { %20 = vsyncpa [#allocation4 + $0x1], 0 }
   0xc   :  { %21 = vsyncpa [#allocation10], 0 }
   0xd   :  { %23 = vsyncpa [#allocation10 + $0x1], 0 }
   0xe   :  { %24 = vsyncpa [#allocation13], 0 }
   0xf   :  { %26 = vsyncpa [#allocation13 + $0x1], 0  ;;  %s1470_s21 = smov 0   ;;  %s1472_s22 = smov 0  }
  0x10   :  { %s1474_s23 = smov 0   ;;  %s1476_s24 = smov 0  }
  0x11   :  { %s1478_s25 = smov 0   ;;  %s1480_s26 = smov 0  }
  0x12   :  { %s1482_s27 = smov 0   ;;  %s1484_s28 = smov 0  }
  0x13   :  { %s1486_s29 = smov 0   ;;  %s1488_s30 = smov 0  }
  0x14   :  { %s1490_s7 = smov 0  }
  0x15 LB: > { %1849 = sst [smem:[#allocation19_spill]] %s1401_s23  ;;  %s1526_s8 = sadd.s32 4294967295, %s1433_s7   ;;  %s1433_s7 = sphi %s1490_s7, %s32_s7   ;;  %s1429_s30 = sphi %s1488_s30, %s1883_s30   ;;  %s1425_s29 = sphi %s1486_s29, %s1889_s29   ;;  %s1421_s28 = sphi %s1484_s28, %s1881_s28   ;;  %s1417_s27 = sphi %s1482_s27, %s1888_s27   ;;  %s1413_s26 = sphi %s1480_s26, %s1880_s26   ;;  %s1409_s25 = sphi %s1478_s25, %s1887_s25   ;;  %s1405_s24 = sphi %s1476_s24, %s1886_s24   ;;  %s1401_s23 = sphi %s1474_s23, %s1878_s23   ;;  %s1397_s22 = sphi %s1472_s22, %s1885_s22   ;;  %s1393_s21 = sphi %s1470_s21, %s1884_s21  }
  0x16   : > { %1850 = sst [smem:[#allocation20_spill]] %s1413_s26  ;;  %s47_s9 = sadd.s32 1, %s1425_s29 }
  0x17   : > { %1851 = sst [smem:[#allocation21_spill]] %s1417_s27  ;;  %p49_p0 = scmp.ge.s32.totalorder %s47_s9, 4 }
  0x18   : > { %1852 = sst [smem:[#allocation22_spill]] %s1421_s28  ;;  %s51_s10 = sadd.s32 1, %s1429_s30 }
  0x19   : > { %1853 = sst [smem:[#allocation23_spill]] %s1429_s30  ;;  %p70_p1 = scmp.eq.s32.totalorder %s1433_s7, 0 }
  0x1a   : > { %p76_p2 = scmp.eq.s32.totalorder %s1526_s8, 0  ;;  %s1891_s9 = smov (%p49_p0, %s47_s9), 0 }
  0x1b   : > { %1854 = sst [smem:[#allocation24_spill]] %s1891_s9  ;;  %s1893_s10 = smov (!%p49_p0, %s51_s10), %s1429_s30 }
  0x1c   : > { %s56_s11 = ssub.s32 %s1425_s29, %s1891_s9  ;;  %p53_p3 = scmp.ge.s32.totalorder %s1893_s10, 2 }
  0x1d   : > { %s86_s12 = ssub.s32 0, %s1425_s29  ;;  %s98_s15 = ssub.s32 0, %s1891_s9 }
  0x1e   : > { %s940_s13 = smin.u32 %s1425_s29, %s86_s12  ;;  %s1895_s10 = smov (%p53_p3, %s1893_s10), 0 }
  0x1f   : > { %1855 = sst [smem:[#allocation25_spill]] %s1895_s10  ;;  %s88_s14 = sand.u32 1, %s940_s13  }
  0x20   : > { %s55_s16 = ssub.s32 %s1429_s30, %s1895_s10  ;;  %s943_s18 = smin.u32 %s98_s15, %s1891_s9 }
  0x21   : > { %s1544_s17 = sor.u32 %s56_s11, %s55_s16  ;;  %s100_s19 = sand.u32 1, %s943_s18  }
  0x22   : > { %p60_p4 = scmp.eq.s32.totalorder %s1544_s17, 0  ;;  %s114_s20 = sadd.s32 1, %s1401_s23 }
  0x23   : > { %p942_p5 = scmp.lt.s32.totalorder %s88_s14, 0  ;;  %s95_s12 = sadd.s32 2, %s88_s14 }
  0x24   : > { %p945_p6 = scmp.lt.s32.totalorder %s100_s19, 0  ;;  %s107_s13 = sadd.s32 2, %s100_s19 }
  0x25   : > { %s1897_s12 = smov (!%p942_p5, %s95_s12), %s88_s14  ;;  %p121_p7 = scmp.ne.s32.totalorder %s1401_s23, %s1397_s22 }
  0x26   : > { %p127_p8 = scmp.ne.s32.totalorder %s1397_s22, %s1393_s21  ;;  %s1899_s13 = smov (!%p945_p6, %s107_s13), %s100_s19 }
  0x27   : > { %p1555_p9 = por %p121_p7, %p70_p1  ;;  %s110_s18 = ssub.s32 %s1897_s12, %s1899_s13 }
  0x28   : > { %p1561_p10 = por %p127_p8, %p76_p2  ;;  %s111_s14 = sor.u32 %s110_s18, %s55_s16 }
  0x29   : > { %p1031_p11 = scmp.lt.s32.totalorder %s1433_s7, 8  ;;  %p112_p12 = scmp.eq.s32.totalorder %s111_s14, 0 }
  0x2a   : > { %s1857_s15 = scalar_select %p1561_p10, 1, 0 }
  0x2b   : > { %s345_s10 = sand.u32 1, %s1433_s7   ;;  %s347_s9 = sand.u32 1, %s1401_s23  }
  0x2c   : > { %1858 = sst [smem:[#allocation26_spill]] %s1857_s15  ;;  %s1571_s19 = sshll.u32 %s347_s9, 3 }
  0x2d   : > { %s1569_s21 = scalar_select %p112_p12, %s1401_s23, %s114_s20  }
  0x2e   : > { %s961_s3 = sshll.u32 %s1429_s30, 1  ;;  %s349_s4 = scalar_lea.vmem [#allocation5], %s1571_s19 }
  0x2f   : > { %1859 = sst [smem:[#allocation27_spill]] %s1569_s21  ;;  %s365_s6 = sadd.s32 %s961_s3, %s1897_s12 }
  0x30   : > { %s962_s5 = sshll.u32 %s365_s6, 3  ;;  %s371_s27 = sshll.u32 %s349_s4, 4  ;;  %s372_s27 = int_to_ptr.vmem [resolvable:$true] %s371_s27 }
  0x31   : > { %s1860_s1 = sld [smem:[#allocation29_spill]]  ;;  %p1582_p13 = pnand %p1031_p11, %p1555_p9 }
  0x32   : > { %s1589_s6 = scalar_lea.hbm %s1827_s2, %s962_s5  ;;  %s1591_s4 = scalar_lea.sflag [#allocation6], %s345_s10 }
  0x33   : > { %p1129_p3 = pneg %p1582_p13 }
  0x37   : > { %s367_s13 = scalar_lea.hbm %s1860_s1, %s962_s5  ;;  %s1132_s15 = scalar_lea.hbm %s1860_s1, 32 }
  0x38   : > { %s369_s16 = sshll.u32 %s367_s13, 4  ;;  %s370_s16 = int_to_ptr.hbm [resolvable:$true] %s369_s16 }
  0x39   : > { %s1125_s28 = sshra.s32 %s370_s16, 4  ;;  %s1126_s28 = int_to_ptr.hbm [resolvable:$true] %s1125_s28 }
  0x3a   : > { %s1127_s20 = scalar_lea.hbm %s1126_s28, 8  ;;  %p1133_p7 = scmp.lt.s32.totalorder %s1126_s28, %s1860_s1 }
  0x3b   : > { %p1128_p0 = scmp.ne.s32.totalorder %s1126_s28, %s1127_s20  ;;  %p1134_p8 = scmp.lt.s32.totalorder %s1132_s15, %s1127_s20 }
  0x3d   : > { %p1130_p5 = pnand %p1129_p3, %p1128_p0  ;;  %p1135_p9 = por %p1134_p8, %p1133_p7 }
  0x3f   : > { %p1131_p6 = pneg %p1130_p5 }
  0x41   : > { %p1136_p12 = pnand %p1135_p9, %p1131_p6 }
  0x43   : > { %1139 = shalt.err (!%p1136_p12)
}
  0x44   : > { %1014 = dma.hbm_to_vmem [thread:$0]  (!%p1582_p13), %s370_s16, 128, %s372_s27, %s1591_s4  }
  0x45   : > { %p969_p0 = scmp.ge.s32.totalorder %s1433_s7, 1  ;;  %p409_p5 = scmp.lt.s32.totalorder %s1433_s7, 9 }
  0x46   : > { %s1840_s10 = sadd.s32 4294967294, %s1433_s7   ;;  %s62_s9 = sadd.s32 1, %s1413_s26 }
  0x47   : > { %p1609_p6 = pnand %p969_p0, %p409_p5  ;;  %p69_p7 = scmp.ne.s32.totalorder %s1413_s26, %s1409_s25 }
  0x48   : > { %s1620_s3 = scalar_select %p60_p4, %s1413_s26, %s62_s9  }
  0x49   : > { %p1624_p8 = por %p70_p1, %p69_p7  ;;  %p75_p9 = scmp.ne.s32.totalorder %s1409_s25, %s1405_s24 }
  0x4a   : > { %1863 = sst [smem:[#allocation28_spill]] %s1620_s3  ;;  %p207_p12 = scmp.eq.s32.totalorder %s1526_s8, 7 }
  0x4b   : > { %p213_p0 = scmp.eq.s32.totalorder %s1840_s10, 7  ;;  %p1635_p5 = por %p76_p2, %p75_p9 }
  0x4c   : > { %s323_s17 = sand.u32 1, %s1413_s26   ;;  %p1640_p4 = por %p207_p12, %p69_p7 }
  0x4d   : > { %p1644_p1 = por %p213_p0, %p75_p9  ;;  %s954_s12 = sshll.u32 %s323_s17, 3 }
  0x4e   : > { %s955_s11 = sshll.u32 %s1429_s30, 2  ;;  %s327_s14 = scalar_lea.vmem [#allocation2], %s954_s12 }
  0x4f   : > { %s332_s15 = sadd.s32 %s1425_s29, %s955_s11  ;;  %s338_s13 = sshll.u32 %s327_s14, 4  ;;  %s339_s13 = int_to_ptr.vmem [resolvable:$true] %s338_s13 }
  0x50   : > { %s956_s9 = sshll.u32 %s332_s15, 3  ;;  %p1009_p2 = pnand %p1031_p11, %p1624_p8 }
  0x51   : > { %s334_s3 = scalar_lea.hbm %s1825_s0, %s956_s9  ;;  %s402_s21 = sshll.u32 %s1589_s6, 4  ;;  %s403_s21 = int_to_ptr.hbm [resolvable:$true] %s402_s21 }
  0x52   : > { %s336_s26 = sshll.u32 %s334_s3, 4  ;;  %s324_s23 = scalar_lea.sflag [#allocation3], %s323_s17  ;;  %s337_s26 = int_to_ptr.hbm [resolvable:$true] %s336_s26 }
  0x53   : > { %1011 = dma.hbm_to_vmem [thread:$0]  (!%p1009_p2), %s337_s26, 128, %s339_s13, %s324_s23  }
  0x54   : > { %s382_s30 = scalar_lea.vmem [#allocation7], %s1571_s19  ;;  %s1185_s12 = sshra.s32 %s403_s21, 4  ;;  %s1186_s12 = int_to_ptr.hbm [resolvable:$true] %s1185_s12 }
  0x55   : > { %s404_s11 = sshll.u32 %s382_s30, 4  ;;  %s1187_s15 = scalar_lea.hbm %s1186_s12, 8  ;;  %s405_s11 = int_to_ptr.vmem [resolvable:$true] %s404_s11 }
  0x56   : > { %p1188_p7 = scmp.ne.s32.totalorder %s1186_s12, %s1187_s15  ;;  %s1192_s3 = scalar_lea.hbm %s1827_s2, 32 }
  0x57   : > { %p1193_p11 = scmp.lt.s32.totalorder %s1186_s12, %s1827_s2  ;;  %p1194_p8 = scmp.lt.s32.totalorder %s1192_s3, %s1187_s15 }
  0x58   : > { %p1190_p9 = pnand %p1188_p7, %p1129_p3 }
  0x59   : > { %p1195_p0 = por %p1194_p8, %p1193_p11 }
  0x5a   : > { %p1191_p12 = pneg %p1190_p9 }
  0x5c   : > { %p1196_p2 = pnand %p1195_p0, %p1191_p12 }
  0x5e   : > { %1199 = shalt.err (!%p1196_p2)
}
  0x5f   : > { %1017 = dma.hbm_to_vmem [thread:$0]  (!%p1582_p13), %s403_s21, 128, %s405_s11, %s1591_s4  }
  0x60   : > { %413 = sbr.rel (%p1609_p6) target bundleno = 630 (0x276), region = 32  ;;  %s1674_s23 = sand.u32 (!%p1609_p6), 1, %s1409_s25  }
  0x61   : > { %s1677_s26 = sshll.u32 (!%p1609_p6), %s1674_s23, 3  ;;  %s416_s30 = scalar_lea.sflag (!%p1609_p6), [#allocation3], %s1674_s23 }
  0x62   : > { %s419_s19 = scalar_lea.vmem (!%p1609_p6), [#allocation2], %s1677_s26 }
  0x65   : > { %1372 = dma.done.wait (%p1635_p5), %s416_s30, 128  }
  0x66   : > { %1374 = vsyncadd (%p1635_p5), %s416_s30, 4294967168  ;;  %s425_s18 = sand.u32 1, %s1526_s8   ;;  %s427_s4 = sand.u32 1, %s1397_s22  }
  0x67   : > { %s1687_s5 = sshll.u32 %s427_s4, 3  ;;  %s426_s17 = scalar_lea.sflag [#allocation6], %s425_s18 }
  0x68   : > { %s429_s14 = scalar_lea.vmem [#allocation5], %s1687_s5 }
  0x69   : > { %1376 = dma.done.wait (%p1561_p10), %s426_s17, 256  }
  0x6a   : > { %1378 = vsyncadd (%p1561_p10), %s426_s17, 4294967040  ;;  %vm522_vm0 = vcmask 261120   ;;  %v520_v0 = vld [vmem:[%s429_s14] sm:$0xff]  ;;  %v518_v1 = vld [vmem:[%s419_s19] sm:$0xff]  ;;  %v551_v3 = vlaneseq  ;;  %vm549_vm1 = vcmask 64512   ;;  %s479_s27 = scalar_lea.vmem [#allocation9], %s1677_s26 }
  0x6b   : > { %977 = vmatpush.xpose.msk.msra.mxu0 %vm522_vm0, %v520_v0  ;;  %v519_v2 = vmul.f32 0.17677669, %v518_v1  ;;  %s486_s13 = scalar_lea.vmem [#allocation11], %s1677_s26  ;;  %s1869_s9 = sld [smem:[#allocation22_spill]] }
  0x6c   : > { %v552_v4 = vshrl.u32 %v551_v3, 7  ;;  %v554_v5 = vand.u32 127, %v551_v3  ;;  %s1870_s11 = sld [smem:[#allocation21_spill]]  ;;  %s439_s12 = scalar_lea.vmem [#allocation7], %s1687_s5 }
  0x6d   : > { %v521_v14 = vld [vmem:[%s439_s12] sm:$0xff]  ;;  %s1871_s28 = sld [smem:[#allocation31_spill]]  ;;  %s659_s21 = sshll.u32 %s479_s27, 4  ;;  %s660_s21 = int_to_ptr.vmem [resolvable:$true] %s659_s21 }
  0x6e   : > { %978 = vmatmul.msk.f32.vlgmr.msra.gmra.mxu0 %vm522_vm0, %v519_v2  ;;  %vm558_vm2 = vcmp.gt.s32.totalorder %v554_v5, %v552_v4  ;;  %605 = vmatpush.msra.mxu1 %v521_v14  ;;  %s1721_s5 = scalar_lea.sflag [#allocation10], %s425_s18 }
  0x71   : > { %s984_s15 = sshll.u32 %s1869_s9, 2 }
  0x72   : > { %s638_s1 = sadd.s32 %s1870_s11, %s984_s15 }
  0x73   : > { %s1711_s10 = sshll.u32 %s638_s1, 3  ;;  %s1872_s19 = smov %s1871_s28 }
  0x74   : > { %s657_s30 = scalar_lea.hbm %s1871_s28, %s1711_s10  ;;  %s1235_s12 = scalar_lea.hbm %s1872_s19, 64 }
  0x75   : > { %s661_s4 = sshll.u32 %s657_s30, 4  ;;  %s662_s4 = int_to_ptr.hbm [resolvable:$true] %s661_s4 }
  0x76   : > { %s1229_s17 = sshra.s32 %s662_s4, 4  ;;  %s1230_s17 = int_to_ptr.hbm [resolvable:$true] %s1229_s17 }
  0x77   : > { %s1231_s14 = scalar_lea.hbm %s1230_s17, 8  ;;  %p1236_p6 = scmp.lt.s32.totalorder %s1230_s17, %s1872_s19 }
  0x78   : > { %p1232_p10 = scmp.ne.s32.totalorder %s1230_s17, %s1231_s14  ;;  %p1237_p5 = scmp.lt.s32.totalorder %s1235_s12, %s1231_s14 }
  0x7a   : > { %p1233_p13 = pnand %p1232_p10, %p1640_p4  ;;  %p1238_p7 = por %p1237_p5, %p1236_p6 }
  0x7c   : > { %p1234_p3 = pneg %p1233_p13 }
  0x7e   : > { %p1239_p9 = pnand %p1238_p7, %p1234_p3 }
  0xeb   : > { %v546_v6 = vpop.f32.mrf.mxu0 }
  0xec   : > { %550 = vst.msk [vmem:[%s479_s27] sm:$0xff] %vm549_vm1, %v546_v6  ;;  %v559_v7 = vsel %vm558_vm2, -3.4028235e+38, %v546_v6 }
  0xed   : > { %560 = vst.msk [vmem:[%s486_s13] sm:$0xff] %vm549_vm1, %v559_v7  ;;  %v561_v8 = vsel %vm549_vm1, %v559_v7, -inf }
  0xee   : > { %562 = vmax.xlane.f32.xlu0 %v561_v8 }
 0x161   : > { %v563_v9 = vpop.xlane.xlu0 %562 }
 0x162   : > { %v564_v10 = vsub.f32 %v559_v7, %v563_v9 }
 0x164   : > { %v565_v11 = vmul.f32 1.442695, %v564_v10 }
 0x166   : > { %1121 = vpow2.f32 %v565_v11 }
 0x16c   : > { %v1122_v12 = vpop.eup %1121 }
 0x16d   : > { %v567_v13 = vsel %vm549_vm1, %v1122_v12, 0.0 }
 0x16e   : > { %568 = vadd.xlane.f32.xlu0 %v567_v13 }
 0x1e1   : > { %v569_v15 = vpop.xlane.xlu0 %568 }
 0x1e2   : > { %1123 = vrcp.f32 %v569_v15  ;;  %v581_v19 = vand.u32 2147483648, %v569_v15  ;;  %v579_v21 = vand.u32 2147483647, %v569_v15  ;;  %vm575_vm4 = vweird.f32 %v569_v15 }
 0x1e4   : > { %v582_v23 = vor.u32 1.1754944e-38, %v581_v19  ;;  %vm580_vm6 = vcmp.eq.f32.partialorder %v579_v21, 8.507059e+37 }
 0x1e8   : > { %v1124_v16 = vpop.eup %1123 }
 0x1e9   : > { %v571_v17 = vmul.f32 %v1124_v16, %v569_v15  ;;  %vm576_vm3 = vweird.f32 %v1124_v16 }
 0x1ea   : > { %vm577_vm5 = vmor %vm575_vm4, %vm576_vm3 }
 0x1eb   : > { %v572_v18 = vsub.f32 1.0, %v571_v17 }
 0x1ed   : > { %v573_v20 = vmul.f32 %v1124_v16, %v572_v18 }
 0x1ef   : > { %v574_v22 = vadd.f32 %v1124_v16, %v573_v20 }
 0x1f1   : > { %v578_v24 = vsel %vm577_vm5, %v1124_v16, %v574_v22 }
 0x1f2   : > { %v583_v25 = vsel %vm580_vm6, %v582_v23, %v578_v24 }
 0x1f3   : > { %v585_v26 = vmul.f32 %v1122_v12, %v583_v25 }
 0x1f4   : > { %1242 = shalt.err (!%p1239_p9)
}
 0x1f5   : > { %1001 = dma.vmem_to_hbm [thread:$0]  (%p1640_p4), %s660_s21, 128, %s662_s4, %s1721_s5   ;;  %979 = vmatmul.msk.f32.vlgmr.msra.gmra.mxu1 %vm549_vm1, %v585_v26 }
 0x1f6   : > { %s493_s8 = scalar_lea.vmem [#allocation12], %s1677_s26  ;;  %s1873_s3 = sld [smem:[#allocation32_spill]] }
 0x1f7   : > { %586 = vst.msk [vmem:[%s493_s8] sm:$0xff] %vm549_vm1, %v585_v26  ;;  %s676_s28 = sshll.u32 %s486_s13, 4  ;;  %s677_s28 = int_to_ptr.vmem [resolvable:$true] %s676_s28 }
 0x1fc   : > { %s674_s6 = scalar_lea.hbm %s1873_s3, %s1711_s10  ;;  %s1263_s9 = scalar_lea.hbm %s1873_s3, 64 }
 0x1fd   : > { %s678_s30 = sshll.u32 %s674_s6, 4  ;;  %s679_s30 = int_to_ptr.hbm [resolvable:$true] %s678_s30 }
 0x1fe   : > { %s1257_s17 = sshra.s32 %s679_s30, 4  ;;  %s1258_s17 = int_to_ptr.hbm [resolvable:$true] %s1257_s17 }
 0x1ff   : > { %s1259_s14 = scalar_lea.hbm %s1258_s17, 8  ;;  %p1264_p0 = scmp.lt.s32.totalorder %s1258_s17, %s1873_s3 }
 0x200   : > { %p1260_p12 = scmp.ne.s32.totalorder %s1258_s17, %s1259_s14  ;;  %p1265_p2 = scmp.lt.s32.totalorder %s1263_s9, %s1259_s14 }
 0x202   : > { %p1261_p11 = pnand %p1260_p12, %p1640_p4  ;;  %p1266_p10 = por %p1265_p2, %p1264_p0 }
 0x204   : > { %p1262_p8 = pneg %p1261_p11 }
 0x206   : > { %p1267_p13 = pnand %p1266_p10, %p1262_p8 }
 0x208   : > { %1270 = shalt.err (!%p1267_p13)
}
 0x209   : > { %1002 = dma.vmem_to_hbm [thread:$0]  (%p1640_p4), %s677_s28, 128, %s679_s30, %s1721_s5  }
 0x20a   : > { %s1874_s15 = sld [smem:[#allocation33_spill]]  ;;  %s693_s1 = sshll.u32 %s493_s8, 4  ;;  %s694_s1 = int_to_ptr.vmem [resolvable:$true] %s693_s1 }
 0x20b   : > { %s627_s17 = scalar_lea.sflag [#allocation13], %s1674_s23 }
 0x210   : > { %s691_s18 = scalar_lea.hbm %s1874_s15, %s1711_s10  ;;  %s1291_s5 = scalar_lea.hbm %s1874_s15, 64 }
 0x211   : > { %s695_s6 = sshll.u32 %s691_s18, 4  ;;  %s696_s6 = int_to_ptr.hbm [resolvable:$true] %s695_s6 }
 0x212   : > { %s1285_s14 = sshra.s32 %s696_s6, 4  ;;  %s1286_s14 = int_to_ptr.hbm [resolvable:$true] %s1285_s14 }
 0x213   : > { %s1287_s21 = scalar_lea.hbm %s1286_s14, 8  ;;  %p1292_p7 = scmp.lt.s32.totalorder %s1286_s14, %s1874_s15 }
 0x214   : > { %p1288_p3 = scmp.ne.s32.totalorder %s1286_s14, %s1287_s21  ;;  %p1293_p9 = scmp.lt.s32.totalorder %s1291_s5, %s1287_s21 }
 0x216   : > { %p1289_p6 = pnand %p1288_p3, %p1640_p4  ;;  %p1294_p12 = por %p1293_p9, %p1292_p7 }
 0x218   : > { %p1290_p5 = pneg %p1289_p6 }
 0x21a   : > { %p1295_p11 = pnand %p1294_p12, %p1290_p5 }
 0x21c   : > { %1298 = shalt.err (!%p1295_p11)
}
 0x21d   : > { %1003 = dma.vmem_to_hbm [thread:$0]  (%p1640_p4), %s694_s1, 128, %s696_s6, %s627_s17  }
 0x21e   : > { %s1875_s12 = sld [smem:[#allocation30_spill]]  ;;  %s472_s27 = scalar_lea.vmem [#allocation8], %s1677_s26 }
 0x21f   : > { %s642_s18 = sshll.u32 %s472_s27, 4  ;;  %s612_s14 = scalar_lea.sflag [#allocation4], %s1674_s23  ;;  %s643_s18 = int_to_ptr.vmem [resolvable:$true] %s642_s18 }
 0x224   : > { %s640_s13 = scalar_lea.hbm %s1875_s12, %s1711_s10  ;;  %s1319_s10 = scalar_lea.hbm %s1875_s12, 64 }
 0x225   : > { %s644_s4 = sshll.u32 %s640_s13, 4  ;;  %s645_s4 = int_to_ptr.hbm [resolvable:$true] %s644_s4 }
 0x226   : > { %s1313_s21 = sshra.s32 %s645_s4, 4  ;;  %s1314_s21 = int_to_ptr.hbm [resolvable:$true] %s1313_s21 }
 0x227   : > { %s1315_s9 = scalar_lea.hbm %s1314_s21, 8  ;;  %p1320_p10 = scmp.lt.s32.totalorder %s1314_s21, %s1875_s12 }
 0x228   : > { %p1316_p8 = scmp.ne.s32.totalorder %s1314_s21, %s1315_s9  ;;  %p1321_p13 = scmp.lt.s32.totalorder %s1319_s10, %s1315_s9 }
 0x22a   : > { %p1317_p0 = pnand %p1316_p8, %p1640_p4  ;;  %p1322_p3 = por %p1321_p13, %p1320_p10 }
 0x22c   : > { %p1318_p2 = pneg %p1317_p0 }
 0x22e   : > { %p1323_p6 = pnand %p1322_p3, %p1318_p2 }
 0x272   : > { %v607_v27 = vpop.f32.mrf.mxu1 }
 0x273   : > { %610 = vst.msk [vmem:[%s472_s27] sm:$0xff] %vm522_vm0, %v607_v27 }
 0x274   : > { %1326 = shalt.err (!%p1323_p6)
}
 0x275   : > { %1000 = dma.vmem_to_hbm [thread:$0]  (%p1640_p4), %s643_s18, 128, %s645_s4, %s612_s14  }
 0x276 PF: > { %p1032_p5 = scmp.ge.s32.totalorder %s1433_s7, 2  ;;  %s707_s23 = sand.u32 1, %s1405_s24  }
 0x277   : > { %s708_s5 = scalar_lea.sflag [#allocation4], %s707_s23 }
 0x278   : > { %p1019_p7 = pnand %p1032_p5, %p1644_p1 }
 0x27a   : > { %p1020_p9 = pneg %p1019_p7 }
 0x27c   : > { %1380 = dma.done.wait (%p1020_p9), %s708_s5, 128  }
 0x27d   : > { %1382 = vsyncadd (%p1020_p9), %s708_s5, 4294967168  ;;  %s1876_s28 = sadd.s32 4294967294, %s1433_s7  }
 0x27e   : > { %s717_s30 = sand.u32 1, %s1876_s28  }
 0x27f   : > { %s718_s8 = scalar_lea.sflag [#allocation10], %s717_s30 }
 0x280   : > { %1384 = dma.done.wait (%p1020_p9), %s718_s8, 256  }
 0x281   : > { %1386 = vsyncadd (%p1020_p9), %s718_s8, 4294967040  ;;  %s738_s16 = scalar_lea.sflag [#allocation13], %s707_s23 }
 0x282   : > { %1388 = dma.done.wait (%p1020_p9), %s738_s16, 128  }
 0x283   : > { %1390 = vsyncadd (%p1020_p9), %s738_s16, 4294967168  ;;  %s32_s7 = sadd.s32 1, %s1433_s7   ;;  %s1877_s24 = sld [smem:[#allocation19_spill]] }
 0x284   : > { %p29_p4 = scmp.ge.s32.totalorder %s32_s7, 10   ;;  %s1878_s23 = sld [smem:[#allocation27_spill]] }
 0x285   : > { %s1879_s20 = sld [smem:[#allocation20_spill]]  ;;  %s1884_s21 = smov %s1397_s22 }
 0x286   : > { %s1880_s26 = sld [smem:[#allocation28_spill]]  ;;  %s1888_s27 = smov %s1425_s29 }
 0x287   : > { %s1881_s28 = sld [smem:[#allocation23_spill]] }
 0x288   : > { %s1882_s11 = sld [smem:[#allocation24_spill]] }
 0x289   : > { %s1883_s30 = sld [smem:[#allocation25_spill]]  ;;  %s1885_s22 = smov %s1877_s24 }
 0x28a   : > { %s1886_s24 = smov %s1409_s25  ;;  %31 = sbr.rel (!%p29_p4) target bundleno = 21 (0x15), region = 150 }
 0x28b   : > { %s1887_s25 = smov %s1879_s20 }
 0x28e   : > { %s1889_s29 = smov %s1882_s11 }
 0x28f   :  { %744 = vsyncpa [#allocation3], 1 }
 0x290   :  { %746 = vsyncpa [#allocation3 + $0x1], 1 }
 0x291   :  { %747 = vsyncpa [#allocation6], 1 }
 0x292   :  { %749 = vsyncpa [#allocation6 + $0x1], 1 }
 0x293   :  { %750 = vsyncpa [#allocation4], 1 }
 0x294   :  { %752 = vsyncpa [#allocation4 + $0x1], 1 }
 0x295   :  { %753 = vsyncpa [#allocation10], 1 }
 0x296   :  { %755 = vsyncpa [#allocation10 + $0x1], 1 }
 0x297   :  { %756 = vsyncpa [#allocation13], 1 }
 0x298   :  { %758 = vsyncpa [#allocation13 + $0x1], 1 }

</bundles_post_ra>
